<compile_context>
chip_gen: v6e
topology: v6e:2x2x1
jax: 0.10.0
libtpu: 0.0.40
codegen_flags: <defaults>
</compile_context>

<pallas_src>
import math
import numpy as np
import jax
import jax.numpy as jnp
from jax.experimental import pallas as pl
from jax.experimental.pallas import tpu as pltpu

# Scaled-down config (original module: H=512, NH=8, L=6, I=2048, OUT=2100)
B, H, L, I, OUT = 8, 128, 2, 256, 250
TB_MAX = 256        # batch-tile upper bound (256-wide MXU on v6e/v7x)
LN_EPS = 1e-12      # HF BertLayerNorm eps


def _round_up(n, m):
    return ((n + m - 1) // m) * m


def _vmem_limit_bytes():
    """85% of the chip's VMEM (capped) — headroom for compiler scratch on v7x,
    room for full weight residency on v5e/v6e."""
    cap = 64 * 1024 * 1024
    try:
        cap = int(getattr(pltpu.get_tpu_info(), "vmem_capacity_bytes", cap))
    except Exception:
        pass
    return max(32 * 1024 * 1024, min(int(cap * 0.85), 112 * 1024 * 1024))


def _layernorm(x, g, b):
    mu = jnp.mean(x, axis=-1, keepdims=True)
    xc = x - mu
    var = jnp.mean(xc * xc, axis=-1, keepdims=True)
    return xc * jax.lax.rsqrt(var + LN_EPS) * g + b


def _gelu(x):
    # TODO(synk): HF BERT's default "gelu" is the exact erf form; the tanh
    # approximation is used for guaranteed Mosaic lowering (tanh -> EUP slot).
    c = math.sqrt(2.0 / math.pi)
    return 0.5 * x * (1.0 + jnp.tanh(c * (x + 0.044715 * x * x * x)))


def bert_kernel(x_ref, emb_ref, wvo_ref, w1_ref, w2_ref, vec_ref, b1_ref,
                wfc_ref, bfc_ref, out_ref):
    bf16 = jnp.bfloat16
    n_layers = wvo_ref.shape[0]

    # --- BertEmbeddings (inputs_embeds path): x + pos + token_type, then LN.
    e = emb_ref[...]                                    # (4, H) f32
    h = x_ref[...] + e[0:1] + e[1:2]
    h = _layernorm(h, e[2:3], e[3:4])

    # --- encoder layers (static unroll; all weights VMEM-resident)
    for l in range(n_layers):
        vl = vec_ref[l]                                 # (6, H) f32

        # self-attention, seq_len == 1: softmax == 1 exactly => ctx == V.
        # Q/K projections are dead; Wv·Wo folded offline into wvo / vl[0].
        attn = jnp.dot(h.astype(bf16), wvo_ref[l],
                       preferred_element_type=jnp.float32) + vl[0:1]
        h = _layernorm(h + attn, vl[1:2], vl[2:3])      # dropout -> identity

        # feed-forward
        f = jnp.dot(h.astype(bf16), w1_ref[l],
                    preferred_element_type=jnp.float32) + b1_ref[l]
        f = _gelu(f)
        f = jnp.dot(f.astype(bf16), w2_ref[l],
                    preferred_element_type=jnp.float32) + vl[3:4]
        h = _layernorm(h + f, vl[4:5], vl[5:6])

    # --- final fc: (tb, H) @ (H, OUT_pad), lane-dense output
    out_ref[...] = jnp.dot(h.astype(bf16), wfc_ref[...],
                           preferred_element_type=jnp.float32) + bfc_ref[...]


def _const_spec(arr):
    """Whole-array, grid-invariant block: DMA'd once, VMEM-resident."""
    nd = arr.ndim
    return pl.BlockSpec(arr.shape, lambda i, nd=nd: (0,) * nd)


def multi_omics_transformer(x, kp):
    """x: (batch, H) float32; kp: prepared (folded/packed/padded) params."""
    bsz, hdim = x.shape
    tb = min(TB_MAX, _round_up(bsz, 8))
    bsz_pad = _round_up(bsz, tb)
    if bsz_pad != bsz:
        x = jnp.pad(x, ((0, bsz_pad - bsz), (0, 0)))
    out_pad = kp["wfc"].shape[1]

    consts = (kp["emb"], kp["wvo"], kp["w1"], kp["w2"],
              kp["vec"], kp["b1"], kp["wfc"], kp["bfc"])

    out = pl.pallas_call(
        bert_kernel,
        out_shape=jax.ShapeDtypeStruct((bsz_pad, out_pad), jnp.float32),
        grid=(bsz_pad // tb,),
        in_specs=[pl.BlockSpec((tb, hdim), lambda i: (i, 0))]
                 + [_const_spec(a) for a in consts],
        out_specs=pl.BlockSpec((tb, out_pad), lambda i: (i, 0)),
        compiler_params=pltpu.CompilerParams(
            dimension_semantics=("parallel",),
            vmem_limit_bytes=_vmem_limit_bytes()),
    )(x, *consts)

    return out[:bsz, :OUT]


def init_params(key):
    """Raw per-op parameters (mirror of the PyTorch module's tensors)."""
    ks = jax.random.split(key, 9)
    std = 0.02  # BERT initializer_range
    bf = jnp.bfloat16

    def nrm(k, shape, dtype=jnp.float32):
        return (jax.random.normal(k, shape, jnp.float32) * std).astype(dtype)

    # Q/K projections are omitted: with seq_len == 1 they provably do not
    # affect the output (softmax over a single key is identically 1).
    return dict(
        pos=nrm(ks[0], (1, H)),
        tok=nrm(ks[1], (1, H)),
        emb_g=jnp.ones((1, H), jnp.float32),
        emb_b=jnp.zeros((1, H), jnp.float32),
        wv=nrm(ks[4], (L, H, H), bf), bv=jnp.zeros((L, 1, H), jnp.float32),
        wo=nrm(ks[5], (L, H, H), bf), bo=jnp.zeros((L, 1, H), jnp.float32),
        ln1_g=jnp.ones((L, 1, H), jnp.float32), ln1_b=jnp.zeros((L, 1, H), jnp.float32),
        w1=nrm(ks[6], (L, H, I), bf), b1=jnp.zeros((L, 1, I), jnp.float32),
        w2=nrm(ks[7], (L, I, H), bf), b2=jnp.zeros((L, 1, H), jnp.float32),
        ln2_g=jnp.ones((L, 1, H), jnp.float32), ln2_b=jnp.zeros((L, 1, H), jnp.float32),
        wfc=nrm(ks[8], (H, OUT), bf), bfc=jnp.zeros((1, OUT), jnp.float32),
    )


def prepare_params(p):
    """One-time param prep (out of the hot path): fold Wv·Wo, pack the small
    per-layer vectors into one slab, pad the fc to a lane-dense width."""
    f32 = lambda a: a.astype(jnp.float32)
    # attn = h @ (Wv·Wo) + (bv·Wo + bo)    -- exact for seq_len == 1
    wvo = jnp.einsum("lij,ljk->lik", f32(p["wv"]), f32(p["wo"])).astype(jnp.bfloat16)
    bvo = jnp.einsum("lxj,ljk->lxk", p["bv"], f32(p["wo"])) + p["bo"]      # (L,1,H)
    vec = jnp.concatenate([bvo, p["ln1_g"], p["ln1_b"],
                           p["b2"], p["ln2_g"], p["ln2_b"]], axis=1)        # (L,6,H)
    emb = jnp.concatenate([p["pos"], p["tok"], p["emb_g"], p["emb_b"]], axis=0)  # (4,H)

    out_pad = _round_up(OUT, 128)
    wfc, bfc = p["wfc"], p["bfc"]
    if out_pad != OUT:
        wfc = jnp.pad(wfc, ((0, 0), (0, out_pad - OUT)))
        bfc = jnp.pad(bfc, ((0, 0), (0, out_pad - OUT)))

    return dict(emb=emb, wvo=wvo, w1=p["w1"], w2=p["w2"], vec=vec, b1=p["b1"],
                wfc=wfc.astype(jnp.bfloat16), bfc=bfc.astype(jnp.float32))


def reference_forward(x, p):
    """Pure-JAX f32 reference of the same forward (unfused attention path)."""
    f32 = lambda a: a.astype(jnp.float32)
    h = x + p["pos"] + p["tok"]
    h = _layernorm(h, p["emb_g"], p["emb_b"])
    for l in range(L):
        v = h @ f32(p["wv"][l]) + p["bv"][l]
        attn = v @ f32(p["wo"][l]) + p["bo"][l]        # seq_len==1 -> ctx == V
        h = _layernorm(h + attn, p["ln1_g"][l], p["ln1_b"][l])
        f = _gelu(h @ f32(p["w1"][l]) + p["b1"][l])
        f = f @ f32(p["w2"][l]) + p["b2"][l]
        h = _layernorm(h + f, p["ln2_g"][l], p["ln2_b"][l])
    return h @ f32(p["wfc"]) + p["bfc"]


if __name__ == "__main__":
    key = jax.random.PRNGKey(0)
    kx, kp = jax.random.split(key)
    x = jax.random.normal(kx, (B, H), jnp.float32)

    raw_params = init_params(kp)
    kernel_params = prepare_params(raw_params)

    out = multi_omics_transformer(x, kernel_params)
    out = jax.block_until_ready(out)

    ref = reference_forward(x, raw_params)
    assert out.shape == (B, OUT)
    np.testing.assert_allclose(np.asarray(out), np.asarray(ref),
                               rtol=2e-2, atol=2e-2)
    print("KERNEL_OK")
</pallas_src>

<mosaic_0001>
module attributes {stable_mosaic.version = 11 : i64} {
  func.func @bert_kernel(%arg0: i32, %arg1: memref<8x128xf32, #tpu.memory_space<vmem>>, %arg2: memref<4x128xf32, #tpu.memory_space<vmem>>, %arg3: memref<2x128x128xbf16, #tpu.memory_space<vmem>>, %arg4: memref<2x128x256xbf16, #tpu.memory_space<vmem>>, %arg5: memref<2x256x128xbf16, #tpu.memory_space<vmem>>, %arg6: memref<2x6x128xf32, #tpu.memory_space<vmem>>, %arg7: memref<2x1x256xf32, #tpu.memory_space<vmem>>, %arg8: memref<128x256xbf16, #tpu.memory_space<vmem>>, %arg9: memref<1x256xf32, #tpu.memory_space<vmem>>, %arg10: memref<8x256xf32, #tpu.memory_space<vmem>>) attributes {dimension_semantics = [#tpu.dimension_semantics<parallel>], iteration_bounds = array<i64: 1>, scalar_prefetch = 0 : i64, scratch_operands = 0 : i64, tpu.core_type = #tpu.core_type<tc>, window_params = [{transform_indices = @transform_0, window_bounds = array<i64: 8, 128>}, {pipeline_mode = #tpu.pipeline_mode<synchronous>, transform_indices = @transform_1, window_bounds = array<i64: 4, 128>}, {pipeline_mode = #tpu.pipeline_mode<synchronous>, transform_indices = @transform_2, window_bounds = array<i64: 2, 128, 128>}, {pipeline_mode = #tpu.pipeline_mode<synchronous>, transform_indices = @transform_3, window_bounds = array<i64: 2, 128, 256>}, {pipeline_mode = #tpu.pipeline_mode<synchronous>, transform_indices = @transform_4, window_bounds = array<i64: 2, 256, 128>}, {pipeline_mode = #tpu.pipeline_mode<synchronous>, transform_indices = @transform_5, window_bounds = array<i64: 2, 6, 128>}, {pipeline_mode = #tpu.pipeline_mode<synchronous>, transform_indices = @transform_6, window_bounds = array<i64: 2, 1, 256>}, {pipeline_mode = #tpu.pipeline_mode<synchronous>, transform_indices = @transform_7, window_bounds = array<i64: 128, 256>}, {pipeline_mode = #tpu.pipeline_mode<synchronous>, transform_indices = @transform_8, window_bounds = array<i64: 1, 256>}, {transform_indices = @transform_9, window_bounds = array<i64: 8, 256>}]} {
    %c0 = arith.constant 0 : index
    %c0_0 = arith.constant 0 : index
    %0 = vector.load %arg2[%c0, %c0_0] : memref<4x128xf32, #tpu.memory_space<vmem>>, vector<4x128xf32>
    %c0_1 = arith.constant 0 : index
    %c0_2 = arith.constant 0 : index
    %1 = vector.load %arg1[%c0_1, %c0_2] : memref<8x128xf32, #tpu.memory_space<vmem>>, vector<8x128xf32>
    %2 = vector.extract_strided_slice %0 {offsets = [0, 0], sizes = [1, 128], strides = [1, 1]} : vector<4x128xf32> to vector<1x128xf32>
    %3 = vector.broadcast %2 : vector<1x128xf32> to vector<8x128xf32>
    %4 = arith.addf %1, %3 : vector<8x128xf32>
    %5 = vector.extract_strided_slice %0 {offsets = [1, 0], sizes = [1, 128], strides = [1, 1]} : vector<4x128xf32> to vector<1x128xf32>
    %6 = vector.broadcast %5 : vector<1x128xf32> to vector<8x128xf32>
    %7 = arith.addf %4, %6 : vector<8x128xf32>
    %8 = vector.extract_strided_slice %0 {offsets = [2, 0], sizes = [1, 128], strides = [1, 1]} : vector<4x128xf32> to vector<1x128xf32>
    %9 = vector.extract_strided_slice %0 {offsets = [3, 0], sizes = [1, 128], strides = [1, 1]} : vector<4x128xf32> to vector<1x128xf32>
    %cst = arith.constant dense<0.000000e+00> : vector<8xf32>
    %10 = vector.multi_reduction <add>, %7, %cst [1] : vector<8x128xf32> to vector<8xf32>
    %11 = vector.shape_cast %10 : vector<8xf32> to vector<8x1xf32>
    %cst_3 = arith.constant 1.280000e+02 : f32
    %12 = vector.broadcast %cst_3 : f32 to vector<8x1xf32>
    %13 = arith.divf %11, %12 : vector<8x1xf32>
    %14 = vector.broadcast %13 : vector<8x1xf32> to vector<8x128xf32>
    %15 = arith.subf %7, %14 : vector<8x128xf32>
    %16 = arith.mulf %15, %15 : vector<8x128xf32>
    %cst_4 = arith.constant dense<0.000000e+00> : vector<8xf32>
    %17 = vector.multi_reduction <add>, %16, %cst_4 [1] : vector<8x128xf32> to vector<8xf32>
    %18 = vector.shape_cast %17 : vector<8xf32> to vector<8x1xf32>
    %cst_5 = arith.constant 1.280000e+02 : f32
    %19 = vector.broadcast %cst_5 : f32 to vector<8x1xf32>
    %20 = arith.divf %18, %19 : vector<8x1xf32>
    %cst_6 = arith.constant 9.99999996E-13 : f32
    %21 = vector.broadcast %cst_6 : f32 to vector<8x1xf32>
    %22 = arith.addf %20, %21 : vector<8x1xf32>
    %23 = math.rsqrt %22 : vector<8x1xf32>
    %24 = vector.broadcast %23 : vector<8x1xf32> to vector<8x128xf32>
    %25 = arith.mulf %15, %24 : vector<8x128xf32>
    %26 = vector.broadcast %8 : vector<1x128xf32> to vector<8x128xf32>
    %27 = arith.mulf %25, %26 : vector<8x128xf32>
    %28 = vector.broadcast %9 : vector<1x128xf32> to vector<8x128xf32>
    %29 = arith.addf %27, %28 : vector<8x128xf32>
    %c0_7 = arith.constant 0 : index
    %c0_8 = arith.constant 0 : index
    %c0_9 = arith.constant 0 : index
    %30 = vector.load %arg6[%c0_7, %c0_8, %c0_9] : memref<2x6x128xf32, #tpu.memory_space<vmem>>, vector<1x6x128xf32>
    %31 = vector.shape_cast %30 : vector<1x6x128xf32> to vector<6x128xf32>
    %32 = arith.truncf %29 : vector<8x128xf32> to vector<8x128xbf16>
    %c0_10 = arith.constant 0 : index
    %c0_11 = arith.constant 0 : index
    %c0_12 = arith.constant 0 : index
    %33 = vector.load %arg3[%c0_10, %c0_11, %c0_12] : memref<2x128x128xbf16, #tpu.memory_space<vmem>>, vector<1x128x128xbf16>
    %34 = vector.shape_cast %33 : vector<1x128x128xbf16> to vector<128x128xbf16>
    %cst_13 = arith.constant dense<0.000000e+00> : vector<8x128xf32>
    %35 = tpu.matmul %32, %34, %cst_13 {dimension_numbers = #tpu.dot_dimension_numbers<[1], [0], [0], [1], [0, 0, 1, 1], [], []>} : vector<8x128xbf16>, vector<128x128xbf16>, vector<8x128xf32> -> vector<8x128xf32>
    %36 = vector.extract_strided_slice %31 {offsets = [0, 0], sizes = [1, 128], strides = [1, 1]} : vector<6x128xf32> to vector<1x128xf32>
    %37 = vector.broadcast %36 : vector<1x128xf32> to vector<8x128xf32>
    %38 = arith.addf %35, %37 : vector<8x128xf32>
    %39 = arith.addf %29, %38 : vector<8x128xf32>
    %40 = vector.extract_strided_slice %31 {offsets = [1, 0], sizes = [1, 128], strides = [1, 1]} : vector<6x128xf32> to vector<1x128xf32>
    %41 = vector.extract_strided_slice %31 {offsets = [2, 0], sizes = [1, 128], strides = [1, 1]} : vector<6x128xf32> to vector<1x128xf32>
    %cst_14 = arith.constant dense<0.000000e+00> : vector<8xf32>
    %42 = vector.multi_reduction <add>, %39, %cst_14 [1] : vector<8x128xf32> to vector<8xf32>
    %43 = vector.shape_cast %42 : vector<8xf32> to vector<8x1xf32>
    %cst_15 = arith.constant 1.280000e+02 : f32
    %44 = vector.broadcast %cst_15 : f32 to vector<8x1xf32>
    %45 = arith.divf %43, %44 : vector<8x1xf32>
    %46 = vector.broadcast %45 : vector<8x1xf32> to vector<8x128xf32>
    %47 = arith.subf %39, %46 : vector<8x128xf32>
    %48 = arith.mulf %47, %47 : vector<8x128xf32>
    %cst_16 = arith.constant dense<0.000000e+00> : vector<8xf32>
    %49 = vector.multi_reduction <add>, %48, %cst_16 [1] : vector<8x128xf32> to vector<8xf32>
    %50 = vector.shape_cast %49 : vector<8xf32> to vector<8x1xf32>
    %cst_17 = arith.constant 1.280000e+02 : f32
    %51 = vector.broadcast %cst_17 : f32 to vector<8x1xf32>
    %52 = arith.divf %50, %51 : vector<8x1xf32>
    %cst_18 = arith.constant 9.99999996E-13 : f32
    %53 = vector.broadcast %cst_18 : f32 to vector<8x1xf32>
    %54 = arith.addf %52, %53 : vector<8x1xf32>
    %55 = math.rsqrt %54 : vector<8x1xf32>
    %56 = vector.broadcast %55 : vector<8x1xf32> to vector<8x128xf32>
    %57 = arith.mulf %47, %56 : vector<8x128xf32>
    %58 = vector.broadcast %40 : vector<1x128xf32> to vector<8x128xf32>
    %59 = arith.mulf %57, %58 : vector<8x128xf32>
    %60 = vector.broadcast %41 : vector<1x128xf32> to vector<8x128xf32>
    %61 = arith.addf %59, %60 : vector<8x128xf32>
    %62 = arith.truncf %61 : vector<8x128xf32> to vector<8x128xbf16>
    %c0_19 = arith.constant 0 : index
    %c0_20 = arith.constant 0 : index
    %c0_21 = arith.constant 0 : index
    %63 = vector.load %arg4[%c0_19, %c0_20, %c0_21] : memref<2x128x256xbf16, #tpu.memory_space<vmem>>, vector<1x128x256xbf16>
    %64 = vector.shape_cast %63 : vector<1x128x256xbf16> to vector<128x256xbf16>
    %cst_22 = arith.constant dense<0.000000e+00> : vector<8x256xf32>
    %65 = tpu.matmul %62, %64, %cst_22 {dimension_numbers = #tpu.dot_dimension_numbers<[1], [0], [0], [1], [0, 0, 1, 1], [], []>} : vector<8x128xbf16>, vector<128x256xbf16>, vector<8x256xf32> -> vector<8x256xf32>
    %c0_23 = arith.constant 0 : index
    %c0_24 = arith.constant 0 : index
    %c0_25 = arith.constant 0 : index
    %66 = vector.load %arg7[%c0_23, %c0_24, %c0_25] : memref<2x1x256xf32, #tpu.memory_space<vmem>>, vector<1x1x256xf32>
    %67 = vector.shape_cast %66 : vector<1x1x256xf32> to vector<1x256xf32>
    %68 = vector.broadcast %67 : vector<1x256xf32> to vector<8x256xf32>
    %69 = arith.addf %65, %68 : vector<8x256xf32>
    %cst_26 = arith.constant 5.000000e-01 : f32
    %70 = vector.broadcast %cst_26 : f32 to vector<8x256xf32>
    %71 = arith.mulf %70, %69 : vector<8x256xf32>
    %cst_27 = arith.constant 4.471500e-02 : f32
    %72 = vector.broadcast %cst_27 : f32 to vector<8x256xf32>
    %73 = arith.mulf %72, %69 : vector<8x256xf32>
    %74 = arith.mulf %73, %69 : vector<8x256xf32>
    %75 = arith.mulf %74, %69 : vector<8x256xf32>
    %76 = arith.addf %69, %75 : vector<8x256xf32>
    %cst_28 = arith.constant 0.797884583 : f32
    %77 = vector.broadcast %cst_28 : f32 to vector<8x256xf32>
    %78 = arith.mulf %77, %76 : vector<8x256xf32>
    %79 = math.tanh %78 : vector<8x256xf32>
    %cst_29 = arith.constant 1.000000e+00 : f32
    %80 = vector.broadcast %cst_29 : f32 to vector<8x256xf32>
    %81 = arith.addf %80, %79 : vector<8x256xf32>
    %82 = arith.mulf %71, %81 : vector<8x256xf32>
    %83 = arith.truncf %82 : vector<8x256xf32> to vector<8x256xbf16>
    %c0_30 = arith.constant 0 : index
    %c0_31 = arith.constant 0 : index
    %c0_32 = arith.constant 0 : index
    %84 = vector.load %arg5[%c0_30, %c0_31, %c0_32] : memref<2x256x128xbf16, #tpu.memory_space<vmem>>, vector<1x256x128xbf16>
    %85 = vector.shape_cast %84 : vector<1x256x128xbf16> to vector<256x128xbf16>
    %cst_33 = arith.constant dense<0.000000e+00> : vector<8x128xf32>
    %86 = tpu.matmul %83, %85, %cst_33 {dimension_numbers = #tpu.dot_dimension_numbers<[1], [0], [0], [1], [0, 0, 1, 1], [], []>} : vector<8x256xbf16>, vector<256x128xbf16>, vector<8x128xf32> -> vector<8x128xf32>
    %87 = vector.extract_strided_slice %31 {offsets = [3, 0], sizes = [1, 128], strides = [1, 1]} : vector<6x128xf32> to vector<1x128xf32>
    %88 = vector.broadcast %87 : vector<1x128xf32> to vector<8x128xf32>
    %89 = arith.addf %86, %88 : vector<8x128xf32>
    %90 = arith.addf %61, %89 : vector<8x128xf32>
    %91 = vector.extract_strided_slice %31 {offsets = [4, 0], sizes = [1, 128], strides = [1, 1]} : vector<6x128xf32> to vector<1x128xf32>
    %92 = vector.extract_strided_slice %31 {offsets = [5, 0], sizes = [1, 128], strides = [1, 1]} : vector<6x128xf32> to vector<1x128xf32>
    %cst_34 = arith.constant dense<0.000000e+00> : vector<8xf32>
    %93 = vector.multi_reduction <add>, %90, %cst_34 [1] : vector<8x128xf32> to vector<8xf32>
    %94 = vector.shape_cast %93 : vector<8xf32> to vector<8x1xf32>
    %cst_35 = arith.constant 1.280000e+02 : f32
    %95 = vector.broadcast %cst_35 : f32 to vector<8x1xf32>
    %96 = arith.divf %94, %95 : vector<8x1xf32>
    %97 = vector.broadcast %96 : vector<8x1xf32> to vector<8x128xf32>
    %98 = arith.subf %90, %97 : vector<8x128xf32>
    %99 = arith.mulf %98, %98 : vector<8x128xf32>
    %cst_36 = arith.constant dense<0.000000e+00> : vector<8xf32>
    %100 = vector.multi_reduction <add>, %99, %cst_36 [1] : vector<8x128xf32> to vector<8xf32>
    %101 = vector.shape_cast %100 : vector<8xf32> to vector<8x1xf32>
    %cst_37 = arith.constant 1.280000e+02 : f32
    %102 = vector.broadcast %cst_37 : f32 to vector<8x1xf32>
    %103 = arith.divf %101, %102 : vector<8x1xf32>
    %cst_38 = arith.constant 9.99999996E-13 : f32
    %104 = vector.broadcast %cst_38 : f32 to vector<8x1xf32>
    %105 = arith.addf %103, %104 : vector<8x1xf32>
    %106 = math.rsqrt %105 : vector<8x1xf32>
    %107 = vector.broadcast %106 : vector<8x1xf32> to vector<8x128xf32>
    %108 = arith.mulf %98, %107 : vector<8x128xf32>
    %109 = vector.broadcast %91 : vector<1x128xf32> to vector<8x128xf32>
    %110 = arith.mulf %108, %109 : vector<8x128xf32>
    %111 = vector.broadcast %92 : vector<1x128xf32> to vector<8x128xf32>
    %112 = arith.addf %110, %111 : vector<8x128xf32>
    %c1 = arith.constant 1 : index
    %c0_39 = arith.constant 0 : index
    %c0_40 = arith.constant 0 : index
    %113 = vector.load %arg6[%c1, %c0_39, %c0_40] : memref<2x6x128xf32, #tpu.memory_space<vmem>>, vector<1x6x128xf32>
    %114 = vector.shape_cast %113 : vector<1x6x128xf32> to vector<6x128xf32>
    %115 = arith.truncf %112 : vector<8x128xf32> to vector<8x128xbf16>
    %c1_41 = arith.constant 1 : index
    %c0_42 = arith.constant 0 : index
    %c0_43 = arith.constant 0 : index
    %116 = vector.load %arg3[%c1_41, %c0_42, %c0_43] : memref<2x128x128xbf16, #tpu.memory_space<vmem>>, vector<1x128x128xbf16>
    %117 = vector.shape_cast %116 : vector<1x128x128xbf16> to vector<128x128xbf16>
    %cst_44 = arith.constant dense<0.000000e+00> : vector<8x128xf32>
    %118 = tpu.matmul %115, %117, %cst_44 {dimension_numbers = #tpu.dot_dimension_numbers<[1], [0], [0], [1], [0, 0, 1, 1], [], []>} : vector<8x128xbf16>, vector<128x128xbf16>, vector<8x128xf32> -> vector<8x128xf32>
    %119 = vector.extract_strided_slice %114 {offsets = [0, 0], sizes = [1, 128], strides = [1, 1]} : vector<6x128xf32> to vector<1x128xf32>
    %120 = vector.broadcast %119 : vector<1x128xf32> to vector<8x128xf32>
    %121 = arith.addf %118, %120 : vector<8x128xf32>
    %122 = arith.addf %112, %121 : vector<8x128xf32>
    %123 = vector.extract_strided_slice %114 {offsets = [1, 0], sizes = [1, 128], strides = [1, 1]} : vector<6x128xf32> to vector<1x128xf32>
    %124 = vector.extract_strided_slice %114 {offsets = [2, 0], sizes = [1, 128], strides = [1, 1]} : vector<6x128xf32> to vector<1x128xf32>
    %cst_45 = arith.constant dense<0.000000e+00> : vector<8xf32>
    %125 = vector.multi_reduction <add>, %122, %cst_45 [1] : vector<8x128xf32> to vector<8xf32>
    %126 = vector.shape_cast %125 : vector<8xf32> to vector<8x1xf32>
    %cst_46 = arith.constant 1.280000e+02 : f32
    %127 = vector.broadcast %cst_46 : f32 to vector<8x1xf32>
    %128 = arith.divf %126, %127 : vector<8x1xf32>
    %129 = vector.broadcast %128 : vector<8x1xf32> to vector<8x128xf32>
    %130 = arith.subf %122, %129 : vector<8x128xf32>
    %131 = arith.mulf %130, %130 : vector<8x128xf32>
    %cst_47 = arith.constant dense<0.000000e+00> : vector<8xf32>
    %132 = vector.multi_reduction <add>, %131, %cst_47 [1] : vector<8x128xf32> to vector<8xf32>
    %133 = vector.shape_cast %132 : vector<8xf32> to vector<8x1xf32>
    %cst_48 = arith.constant 1.280000e+02 : f32
    %134 = vector.broadcast %cst_48 : f32 to vector<8x1xf32>
    %135 = arith.divf %133, %134 : vector<8x1xf32>
    %cst_49 = arith.constant 9.99999996E-13 : f32
    %136 = vector.broadcast %cst_49 : f32 to vector<8x1xf32>
    %137 = arith.addf %135, %136 : vector<8x1xf32>
    %138 = math.rsqrt %137 : vector<8x1xf32>
    %139 = vector.broadcast %138 : vector<8x1xf32> to vector<8x128xf32>
    %140 = arith.mulf %130, %139 : vector<8x128xf32>
    %141 = vector.broadcast %123 : vector<1x128xf32> to vector<8x128xf32>
    %142 = arith.mulf %140, %141 : vector<8x128xf32>
    %143 = vector.broadcast %124 : vector<1x128xf32> to vector<8x128xf32>
    %144 = arith.addf %142, %143 : vector<8x128xf32>
    %145 = arith.truncf %144 : vector<8x128xf32> to vector<8x128xbf16>
    %c1_50 = arith.constant 1 : index
    %c0_51 = arith.constant 0 : index
    %c0_52 = arith.constant 0 : index
    %146 = vector.load %arg4[%c1_50, %c0_51, %c0_52] : memref<2x128x256xbf16, #tpu.memory_space<vmem>>, vector<1x128x256xbf16>
    %147 = vector.shape_cast %146 : vector<1x128x256xbf16> to vector<128x256xbf16>
    %cst_53 = arith.constant dense<0.000000e+00> : vector<8x256xf32>
    %148 = tpu.matmul %145, %147, %cst_53 {dimension_numbers = #tpu.dot_dimension_numbers<[1], [0], [0], [1], [0, 0, 1, 1], [], []>} : vector<8x128xbf16>, vector<128x256xbf16>, vector<8x256xf32> -> vector<8x256xf32>
    %c1_54 = arith.constant 1 : index
    %c0_55 = arith.constant 0 : index
    %c0_56 = arith.constant 0 : index
    %149 = vector.load %arg7[%c1_54, %c0_55, %c0_56] : memref<2x1x256xf32, #tpu.memory_space<vmem>>, vector<1x1x256xf32>
    %150 = vector.shape_cast %149 : vector<1x1x256xf32> to vector<1x256xf32>
    %151 = vector.broadcast %150 : vector<1x256xf32> to vector<8x256xf32>
    %152 = arith.addf %148, %151 : vector<8x256xf32>
    %cst_57 = arith.constant 5.000000e-01 : f32
    %153 = vector.broadcast %cst_57 : f32 to vector<8x256xf32>
    %154 = arith.mulf %153, %152 : vector<8x256xf32>
    %cst_58 = arith.constant 4.471500e-02 : f32
    %155 = vector.broadcast %cst_58 : f32 to vector<8x256xf32>
    %156 = arith.mulf %155, %152 : vector<8x256xf32>
    %157 = arith.mulf %156, %152 : vector<8x256xf32>
    %158 = arith.mulf %157, %152 : vector<8x256xf32>
    %159 = arith.addf %152, %158 : vector<8x256xf32>
    %cst_59 = arith.constant 0.797884583 : f32
    %160 = vector.broadcast %cst_59 : f32 to vector<8x256xf32>
    %161 = arith.mulf %160, %159 : vector<8x256xf32>
    %162 = math.tanh %161 : vector<8x256xf32>
    %cst_60 = arith.constant 1.000000e+00 : f32
    %163 = vector.broadcast %cst_60 : f32 to vector<8x256xf32>
    %164 = arith.addf %163, %162 : vector<8x256xf32>
    %165 = arith.mulf %154, %164 : vector<8x256xf32>
    %166 = arith.truncf %165 : vector<8x256xf32> to vector<8x256xbf16>
    %c1_61 = arith.constant 1 : index
    %c0_62 = arith.constant 0 : index
    %c0_63 = arith.constant 0 : index
    %167 = vector.load %arg5[%c1_61, %c0_62, %c0_63] : memref<2x256x128xbf16, #tpu.memory_space<vmem>>, vector<1x256x128xbf16>
    %168 = vector.shape_cast %167 : vector<1x256x128xbf16> to vector<256x128xbf16>
    %cst_64 = arith.constant dense<0.000000e+00> : vector<8x128xf32>
    %169 = tpu.matmul %166, %168, %cst_64 {dimension_numbers = #tpu.dot_dimension_numbers<[1], [0], [0], [1], [0, 0, 1, 1], [], []>} : vector<8x256xbf16>, vector<256x128xbf16>, vector<8x128xf32> -> vector<8x128xf32>
    %170 = vector.extract_strided_slice %114 {offsets = [3, 0], sizes = [1, 128], strides = [1, 1]} : vector<6x128xf32> to vector<1x128xf32>
    %171 = vector.broadcast %170 : vector<1x128xf32> to vector<8x128xf32>
    %172 = arith.addf %169, %171 : vector<8x128xf32>
    %173 = arith.addf %144, %172 : vector<8x128xf32>
    %174 = vector.extract_strided_slice %114 {offsets = [4, 0], sizes = [1, 128], strides = [1, 1]} : vector<6x128xf32> to vector<1x128xf32>
    %175 = vector.extract_strided_slice %114 {offsets = [5, 0], sizes = [1, 128], strides = [1, 1]} : vector<6x128xf32> to vector<1x128xf32>
    %cst_65 = arith.constant dense<0.000000e+00> : vector<8xf32>
    %176 = vector.multi_reduction <add>, %173, %cst_65 [1] : vector<8x128xf32> to vector<8xf32>
    %177 = vector.shape_cast %176 : vector<8xf32> to vector<8x1xf32>
    %cst_66 = arith.constant 1.280000e+02 : f32
    %178 = vector.broadcast %cst_66 : f32 to vector<8x1xf32>
    %179 = arith.divf %177, %178 : vector<8x1xf32>
    %180 = vector.broadcast %179 : vector<8x1xf32> to vector<8x128xf32>
    %181 = arith.subf %173, %180 : vector<8x128xf32>
    %182 = arith.mulf %181, %181 : vector<8x128xf32>
    %cst_67 = arith.constant dense<0.000000e+00> : vector<8xf32>
    %183 = vector.multi_reduction <add>, %182, %cst_67 [1] : vector<8x128xf32> to vector<8xf32>
    %184 = vector.shape_cast %183 : vector<8xf32> to vector<8x1xf32>
    %cst_68 = arith.constant 1.280000e+02 : f32
    %185 = vector.broadcast %cst_68 : f32 to vector<8x1xf32>
    %186 = arith.divf %184, %185 : vector<8x1xf32>
    %cst_69 = arith.constant 9.99999996E-13 : f32
    %187 = vector.broadcast %cst_69 : f32 to vector<8x1xf32>
    %188 = arith.addf %186, %187 : vector<8x1xf32>
    %189 = math.rsqrt %188 : vector<8x1xf32>
    %190 = vector.broadcast %189 : vector<8x1xf32> to vector<8x128xf32>
    %191 = arith.mulf %181, %190 : vector<8x128xf32>
    %192 = vector.broadcast %174 : vector<1x128xf32> to vector<8x128xf32>
    %193 = arith.mulf %191, %192 : vector<8x128xf32>
    %194 = vector.broadcast %175 : vector<1x128xf32> to vector<8x128xf32>
    %195 = arith.addf %193, %194 : vector<8x128xf32>
    %196 = arith.truncf %195 : vector<8x128xf32> to vector<8x128xbf16>
    %c0_70 = arith.constant 0 : index
    %c0_71 = arith.constant 0 : index
    %197 = vector.load %arg8[%c0_70, %c0_71] : memref<128x256xbf16, #tpu.memory_space<vmem>>, vector<128x256xbf16>
    %cst_72 = arith.constant dense<0.000000e+00> : vector<8x256xf32>
    %198 = tpu.matmul %196, %197, %cst_72 {dimension_numbers = #tpu.dot_dimension_numbers<[1], [0], [0], [1], [0, 0, 1, 1], [], []>} : vector<8x128xbf16>, vector<128x256xbf16>, vector<8x256xf32> -> vector<8x256xf32>
    %c0_73 = arith.constant 0 : index
    %c0_74 = arith.constant 0 : index
    %199 = vector.load %arg9[%c0_73, %c0_74] : memref<1x256xf32, #tpu.memory_space<vmem>>, vector<1x256xf32>
    %200 = vector.broadcast %199 : vector<1x256xf32> to vector<8x256xf32>
    %201 = arith.addf %198, %200 : vector<8x256xf32>
    %c0_75 = arith.constant 0 : index
    %c0_76 = arith.constant 0 : index
    %202 = vector.load %arg10[%c0_75, %c0_76] : memref<8x256xf32, #tpu.memory_space<vmem>>, vector<8x256xf32>
    tpu.vector_store %arg10[%c0_75, %c0_76], %201 {strides = array<i32>} : memref<8x256xf32, #tpu.memory_space<vmem>>, vector<8x256xf32>,
    return
  }
  func.func @transform_0(%arg0: i32) -> (i32, i32) {
    %c0_i32 = arith.constant 0 : i32
    %c0_i32_0 = arith.constant 0 : i32
    return %arg0, %c0_i32 : i32, i32
  }
  func.func @transform_1(%arg0: i32) -> (i32, i32) {
    %c0_i32 = arith.constant 0 : i32
    %c0_i32_0 = arith.constant 0 : i32
    %c0_i32_1 = arith.constant 0 : i32
    return %c0_i32, %c0_i32_0 : i32, i32
  }
  func.func @transform_2(%arg0: i32) -> (i32, i32, i32) {
    %c0_i32 = arith.constant 0 : i32
    %c0_i32_0 = arith.constant 0 : i32
    %c0_i32_1 = arith.constant 0 : i32
    %c0_i32_2 = arith.constant 0 : i32
    return %c0_i32, %c0_i32_0, %c0_i32_1 : i32, i32, i32
  }
  func.func @transform_3(%arg0: i32) -> (i32, i32, i32) {
    %c0_i32 = arith.constant 0 : i32
    %c0_i32_0 = arith.constant 0 : i32
    %c0_i32_1 = arith.constant 0 : i32
    %c0_i32_2 = arith.constant 0 : i32
    return %c0_i32, %c0_i32_0, %c0_i32_1 : i32, i32, i32
  }
  func.func @transform_4(%arg0: i32) -> (i32, i32, i32) {
    %c0_i32 = arith.constant 0 : i32
    %c0_i32_0 = arith.constant 0 : i32
    %c0_i32_1 = arith.constant 0 : i32
    %c0_i32_2 = arith.constant 0 : i32
    return %c0_i32, %c0_i32_0, %c0_i32_1 : i32, i32, i32
  }
  func.func @transform_5(%arg0: i32) -> (i32, i32, i32) {
    %c0_i32 = arith.constant 0 : i32
    %c0_i32_0 = arith.constant 0 : i32
    %c0_i32_1 = arith.constant 0 : i32
    %c0_i32_2 = arith.constant 0 : i32
    return %c0_i32, %c0_i32_0, %c0_i32_1 : i32, i32, i32
  }
  func.func @transform_6(%arg0: i32) -> (i32, i32, i32) {
    %c0_i32 = arith.constant 0 : i32
    %c0_i32_0 = arith.constant 0 : i32
    %c0_i32_1 = arith.constant 0 : i32
    %c0_i32_2 = arith.constant 0 : i32
    return %c0_i32, %c0_i32_0, %c0_i32_1 : i32, i32, i32
  }
  func.func @transform_7(%arg0: i32) -> (i32, i32) {
    %c0_i32 = arith.constant 0 : i32
    %c0_i32_0 = arith.constant 0 : i32
    %c0_i32_1 = arith.constant 0 : i32
    return %c0_i32, %c0_i32_0 : i32, i32
  }
  func.func @transform_8(%arg0: i32) -> (i32, i32) {
    %c0_i32 = arith.constant 0 : i32
    %c0_i32_0 = arith.constant 0 : i32
    %c0_i32_1 = arith.constant 0 : i32
    return %c0_i32, %c0_i32_0 : i32, i32
  }
  func.func @transform_9(%arg0: i32) -> (i32, i32) {
    %c0_i32 = arith.constant 0 : i32
    %c0_i32_0 = arith.constant 0 : i32
    return %arg0, %c0_i32 : i32, i32
  }
}

</mosaic_0001>

<bundles_post_ra>
// kernel: tpu_custom_call.1
= control target key start
LH: loop header
LB: loop body
LE: loop exit
PB: predicated region body
PF: predicated region fallthrough
CT: control target
= control target key end

     0   :  { %14 = vsyncpa [#allocation3], 0  ;;  %s1942_s0 = inlined_call_operand.vmem [shape: f32[8,128], index: 0, kind: input, shape index: {}]   ;;  %s1943_s1 = inlined_call_operand.vmem [shape: f32[4,128], index: 1, kind: input, shape index: {}]   ;;  %s1944_s2 = inlined_call_operand.hbm [shape: bf16[2,128,128], index: 2, kind: input, shape index: {}]   ;;  %s1945_s3 = inlined_call_operand.hbm [shape: bf16[2,128,256], index: 3, kind: input, shape index: {}]   ;;  %s1946_s4 = inlined_call_operand.hbm [shape: bf16[2,256,128], index: 4, kind: input, shape index: {}]   ;;  %s1947_s5 = inlined_call_operand.vmem [shape: f32[2,6,128], index: 5, kind: input, shape index: {}]   ;;  %s1948_s6 = inlined_call_operand.vmem [shape: f32[2,1,256], index: 6, kind: input, shape index: {}]   ;;  %s1949_s7 = inlined_call_operand.hbm [shape: bf16[128,256], index: 7, kind: input, shape index: {}]   ;;  %s1950_s8 = inlined_call_operand.vmem [shape: f32[1,256], index: 8, kind: input, shape index: {}]   ;;  %s1951_s9 = inlined_call_operand.hbm [shape: f32[8,256], index: 9, kind: output, shape index: {}]  }
   0x1   :  { %15 = vsyncpa [#allocation6], 0 }
   0x2   :  { %16 = vsyncpa [#allocation9], 0 }
   0x3   :  { %17 = vsyncpa [#allocation4], 0  ;;  %s1747_s30 = smov [#allocation5]  }
   0x4   :  { %s39_s10 = sshll.u32 %s1747_s30, 4  ;;  %s40_s10 = int_to_ptr.vmem [resolvable:$true] %s39_s10 }
   0x5   :  { %s1647_s11 = scalar_lea.vmem %s40_s10, 4096  ;;  %p1652_p1 = scmp.lt.s32.totalorder %s40_s10, %s40_s10 }
   0x6   :  { %p1648_p0 = scmp.ne.s32.totalorder %s40_s10, %s1647_s11  ;;  %p1653_p2 = scmp.lt.s32.totalorder %s1647_s11, %s1647_s11 }
   0x8   :  { %p1654_p3 = por %p1653_p2, %p1652_p1 }
   0xa   :  { %p1655_p4 = pnand %p1654_p3, %p1648_p0 }
   0xc   :  { %1658 = shalt.err (!%p1655_p4)
}
   0xd   :  { %s1748_s12 = smov 128   ;;  %s1749_s13 = smov 8  }
   0xe   :  { %45 = dma.hbm_to_vmem [thread:$0]  %s1945_s3, 4096, %s40_s10, [#allocation6], %s1748_s12, %s1748_s12, %s1749_s13  }
   0xf   :  { %s1750_s16 = smov [#allocation2]  }
  0x10   :  { %s27_s17 = sshll.u32 %s1750_s16, 4  ;;  %s28_s17 = int_to_ptr.vmem [resolvable:$true] %s27_s17 }
  0x11   :  { %s1667_s18 = scalar_lea.vmem %s28_s17, 2048  ;;  %p1672_p6 = scmp.lt.s32.totalorder %s28_s17, %s28_s17 }
  0x12   :  { %p1668_p5 = scmp.ne.s32.totalorder %s28_s17, %s1667_s18  ;;  %p1673_p7 = scmp.lt.s32.totalorder %s1667_s18, %s1667_s18 }
  0x14   :  { %p1674_p8 = por %p1673_p7, %p1672_p6 }
  0x16   :  { %p1675_p9 = pnand %p1674_p8, %p1668_p5 }
  0x18   :  { %1678 = shalt.err (!%p1675_p9)
}
  0x19   :  { %s1751_s19 = smov 64   ;;  %s1752_s20 = smov 4  }
  0x1a   :  { %33 = dma.hbm_to_vmem [thread:$0]  %s1944_s2, 2048, %s28_s17, [#allocation3], %s1751_s19, %s1751_s19, %s1752_s20  }
  0x1b   :  { %s1753_s23 = smov [#allocation7]   ;;  %s1754_s25 = smov [#allocation8]  }
  0x1c   :  { %s51_s24 = sshll.u32 %s1753_s23, 4  ;;  %s67_s3 = sshll.u32 %s1754_s25, 4  ;;  %s52_s24 = int_to_ptr.vmem [resolvable:$true] %s51_s24  ;;  %s68_s3 = int_to_ptr.vmem [resolvable:$true] %s67_s3 }
  0x1d   :  { %s1687_s26 = scalar_lea.vmem %s52_s24, 4096  ;;  %p1692_p11 = scmp.lt.s32.totalorder %s52_s24, %s52_s24 }
  0x1e   :  { %p1688_p10 = scmp.ne.s32.totalorder %s52_s24, %s1687_s26  ;;  %p1693_p12 = scmp.lt.s32.totalorder %s1687_s26, %s1687_s26 }
  0x20   :  { %p1694_p13 = por %p1693_p12, %p1692_p11 }
  0x22   :  { %p1695_p0 = pnand %p1694_p13, %p1688_p10 }
  0x24   :  { %1698 = shalt.err (!%p1695_p0)
}
  0x25   :  { %57 = dma.hbm_to_vmem [thread:$0]  %s1946_s4, 4096, %s52_s24, [#allocation6], %s1751_s19, %s1751_s19, %s1752_s20  }
  0x26   :  { %s1707_s29 = scalar_lea.vmem %s68_s3, 2048  ;;  %p1712_p2 = scmp.lt.s32.totalorder %s68_s3, %s68_s3 }
  0x27   :  { %p1708_p1 = scmp.ne.s32.totalorder %s68_s3, %s1707_s29  ;;  %p1713_p3 = scmp.lt.s32.totalorder %s1707_s29, %s1707_s29 }
  0x29   :  { %p1714_p4 = por %p1713_p3, %p1712_p2 }
  0x2b   :  { %p1715_p5 = pnand %p1714_p4, %p1708_p1 }
  0x2d   :  { %1718 = shalt.err (!%p1715_p5)
}
  0x2e   :  { %73 = dma.hbm_to_vmem [thread:$0]  %s1949_s7, 2048, %s68_s3, [#allocation9], %s1748_s12, %s1748_s12, %s1749_s13  }
  0x2f   :  { %1739 = dma.done.wait [#allocation3], 2048  }
  0x30   :  { %1740 = vsyncadd [#allocation3], 4294965248 }
  0x31   :  { %1741 = dma.done.wait [#allocation6], 8192  }
  0x32   :  { %1742 = vsyncadd [#allocation6], 4294959104 }
  0x33   :  { %1743 = dma.done.wait [#allocation9], 2048  }
  0x34   :  { %1744 = vsyncadd [#allocation9], 4294965248  ;;  %v91_v0 = vlaneseq  ;;  %v89_v4 = vld [vmem:[%s1943_s1] sm:$0xf]  ;;  %v1501_v10 = vld [vmem:[#allocation2 + $0x38] sm:$0xff]   ;;  %v1755_v12 = vmov 0.0  }
  0x35   :  { %v90_v5 = vld [vmem:[%s1942_s0] sm:$0xff]  ;;  %v1502_v11 = vld [vmem:[#allocation2 + $0x30] sm:$0xff]   ;;  %1449 = vmatprep.subr.bf16.mxu0 %v1755_v12  ;;  %v1503_v17 = vld [vmem:[#allocation2 + $0x28] sm:$0xff]   ;;  %vm1756_vm0 = vmmov 0   ;;  %v1757_v58 = vmov 0   ;;  %s1758_s18 = smov [#allocation10]  }
  0x36   :  { %v1827_v1 = vshrl.u32 %v91_v0, 7  ;;  %1450 = vmatpush3.bf16.msra.mxu0 %v1501_v10  ;;  %v1504_v18 = vld [vmem:[#allocation2 + $0x20] sm:$0xff]   ;;  %1465 = vmatprep.mubr.msk.bf16.mxu0 %vm1756_vm0, %v1755_v12  ;;  %v1505_v19 = vld [vmem:[#allocation2 + $0x18] sm:$0xff]   ;;  %v1506_v20 = vld [vmem:[#allocation2 + $0x10] sm:$0xff]   ;;  %s1278_s19 = sshll.u32 %s1758_s18, 4  ;;  %s1279_s19 = int_to_ptr.vmem [resolvable:$true] %s1278_s19 }
  0x37   :  { %1451 = vmatprep.subr.bf16.mxu0 %v1755_v12  ;;  %v1507_v21 = vld [vmem:[#allocation2 + $0x8] sm:$0xff]   ;;  %v1508_v22 = vld [vmem:[#allocation2] sm:$0xff]   ;;  %v1509_v43 = vld [vmem:[#allocation5 + $0x74] ss:$8 sps:$4 sm:$0xff]   ;;  %396 = vmatprep.mubr.bf16.mxu1 %v1757_v58  ;;  %s1719_s20 = scalar_lea.vmem %s1279_s19, 256  ;;  %p1724_p7 = scmp.lt.s32.totalorder %s1279_s19, %s1279_s19 }
  0x38   :  { %v1830_v2 = vsub.s32 0, %v1827_v1  ;;  %v1833_v3 = vsub.s32 1, %v1827_v1  ;;  %v1854_v26 = vsub.s32 2, %v1827_v1  ;;  %v1857_v27 = vsub.s32 3, %v1827_v1  ;;  %v1864_v35 = vld [vmem:[%s1947_s5] sm:$0x3f]  ;;  %364 = vmatprep.subr.bf16.mxu1 %v1509_v43  ;;  %p1720_p6 = scmp.ne.s32.totalorder %s1279_s19, %s1719_s20  ;;  %p1725_p8 = scmp.lt.s32.totalorder %s1719_s20, %s1719_s20 }
  0x39   :  { %v1511_v44 = vld [vmem:[#allocation5 + $0x70] ss:$8 sps:$4 sm:$0xff]   ;;  %v1512_v45 = vld [vmem:[#allocation5 + $0x64] ss:$8 sps:$4 sm:$0xff]   ;;  %v1514_v46 = vld [vmem:[#allocation5 + $0x60] ss:$8 sps:$4 sm:$0xff]  }
  0x3a   :  { %v94_v6 = vrot.slane %v89_v4, %v1830_v2  ;;  %v99_v7 = vrot.slane %v89_v4, %v1833_v3  ;;  %1452 = vmatpush3.bf16.msra.mxu0 %v1502_v11  ;;  %v116_v28 = vrot.slane %v89_v4, %v1854_v26  ;;  %v121_v31 = vrot.slane %v89_v4, %v1857_v27  ;;  %v1515_v51 = vld [vmem:[#allocation5 + $0x54] ss:$8 sps:$4 sm:$0xff]   ;;  %v1517_v52 = vld [vmem:[#allocation5 + $0x50] ss:$8 sps:$4 sm:$0xff]   ;;  %v1518_v53 = vld [vmem:[#allocation5 + $0x44] ss:$8 sps:$4 sm:$0xff]   ;;  %p1726_p9 = por %p1725_p8, %p1724_p7 }
  0x3b   :  { %1453 = vmatprep.subr.bf16.mxu0 %v1755_v12  ;;  %v144_v36 = vrot.slane %v1864_v35, %v1830_v2  ;;  %365 = vmatpush1.bf16.msra.mxu1 %v1511_v44  ;;  %v1520_v54 = vld [vmem:[#allocation5 + $0x40] ss:$8 sps:$4 sm:$0xff]   ;;  %v1521_v55 = vld [vmem:[#allocation5 + $0x34] ss:$8 sps:$4 sm:$0xff]   ;;  %v1523_v56 = vld [vmem:[#allocation5 + $0x30] ss:$8 sps:$4 sm:$0xff]  }
  0x3c   :  { %v95_v8 = vadd.f32 %v94_v6, %v90_v5  ;;  %366 = vmatprep.subr.bf16.mxu1 %v1512_v45  ;;  %v1524_v57 = vld [vmem:[#allocation5 + $0x24] ss:$8 sps:$4 sm:$0xff]   ;;  %v1526_v59 = vld [vmem:[#allocation5 + $0x20] ss:$8 sps:$4 sm:$0xff]   ;;  %v1527_v60 = vld [vmem:[#allocation5 + $0x14] ss:$8 sps:$4 sm:$0xff]   ;;  %v248_v6 = vrot.slane %v1864_v35, %v1833_v3  ;;  %p1727_p10 = pnand %p1726_p9, %p1720_p6 }
  0x3d   :  { %v1529_v61 = vld [vmem:[#allocation5 + $0x10] ss:$8 sps:$4 sm:$0xff]   ;;  %v1530_v62 = vld [vmem:[#allocation5 + $0x4] ss:$8 sps:$4 sm:$0xff]   ;;  %v1532_v63 = vld [vmem:[#allocation5] ss:$8 sps:$4 sm:$0xff]  }
  0x3e   :  { %v100_v9 = vadd.f32 %v99_v7, %v95_v8  ;;  %1454 = vmatpush3.bf16.msra.mxu0 %v1503_v17  ;;  %v1536_v17 = vld [vmem:[#allocation7 + $0x30] sm:$0xff]  }
  0x3f   :  { %1455 = vmatprep.subr.bf16.mxu0 %v1755_v12  ;;  %367 = vmatpush1.bf16.msra.mxu1 %v1514_v46 }
  0x40   :  { %101 = vadd.xlane.f32.xlu0 %v100_v9  ;;  %368 = vmatprep.subr.bf16.mxu1 %v1515_v51 }
  0x42   :  { %1456 = vmatpush3.bf16.msra.mxu0 %v1504_v18  ;;  %v1537_v18 = vld [vmem:[#allocation7 + $0x68] sm:$0xff]  }
  0x43   :  { %1457 = vmatprep.subr.bf16.mxu0 %v1755_v12  ;;  %369 = vmatpush1.bf16.msra.mxu1 %v1517_v52 }
  0x44   :  { %370 = vmatprep.subr.bf16.mxu1 %v1518_v53 }
  0x46   :  { %1458 = vmatpush3.bf16.msra.mxu0 %v1505_v19  ;;  %v1538_v19 = vld [vmem:[#allocation7 + $0x28] sm:$0xff]  }
  0x47   :  { %1459 = vmatprep.subr.bf16.mxu0 %v1755_v12  ;;  %371 = vmatpush1.bf16.msra.mxu1 %v1520_v54 }
  0x48   :  { %372 = vmatprep.subr.bf16.mxu1 %v1521_v55 }
  0x4a   :  { %1460 = vmatpush3.bf16.msra.mxu0 %v1506_v20  ;;  %v1539_v20 = vld [vmem:[#allocation7 + $0x60] sm:$0xff]  }
  0x4b   :  { %1461 = vmatprep.subr.bf16.mxu0 %v1755_v12  ;;  %373 = vmatpush1.bf16.msra.mxu1 %v1523_v56 }
  0x4c   :  { %374 = vmatprep.subr.bf16.mxu1 %v1524_v57 }
  0x4e   :  { %1462 = vmatpush3.bf16.msra.mxu0 %v1507_v21  ;;  %v1540_v21 = vld [vmem:[#allocation7 + $0x20] sm:$0xff]  }
  0x4f   :  { %1463 = vmatprep.subr.bf16.mxu0 %v1755_v12  ;;  %375 = vmatpush1.bf16.msra.mxu1 %v1526_v59 }
  0x50   :  { %376 = vmatprep.subr.bf16.mxu1 %v1527_v60 }
  0x52   :  { %1464 = vmatpush3.bf16.msra.mxu0 %v1508_v22  ;;  %v1541_v22 = vld [vmem:[#allocation7 + $0x58] sm:$0xff]  }
  0x53   :  { %377 = vmatpush1.bf16.msra.mxu1 %v1529_v61 }
  0x54   :  { %378 = vmatprep.subr.bf16.mxu1 %v1530_v62 }
  0x57   :  { %379 = vmatpush1.bf16.msra.mxu1 %v1532_v63 }
  0x58   :  { %1469 = vmatprep.subr.bf16.mxu1 %v1755_v12 }
  0xc9   :  { %v102_v13 = vpop.xlane.xlu0 %101 }
  0xca   :  { %v104_v14 = vmul.f32 0.0078125, %v102_v13 }
  0xcc   :  { %v105_v15 = vsub.f32 %v100_v9, %v104_v14  ;;  %v253_v9 = vrot.slane %v1864_v35, %v1854_v26  ;;  %v1533_v14 = vld [vmem:[#allocation7 + $0x78] sm:$0xff]  }
  0xcd   :  { %1396 = vmatprep.subr.bf16.mxu0 %v1533_v14 }
  0xce   :  { %v106_v16 = vmul.f32 %v105_v15, %v105_v15 }
  0xd0   :  { %107 = vadd.xlane.f32.xlu0 %v106_v16  ;;  %v1535_v16 = vld [vmem:[#allocation7 + $0x70] sm:$0xff]  }
 0x159   :  { %v108_v23 = vpop.xlane.xlu0 %107 }
 0x15a   :  { %v109_v24 = vmul.f32 0.0078125, %v108_v23  ;;  %v1542_v23 = vld [vmem:[#allocation7 + $0x18] sm:$0xff]  }
 0x15c   :  { %v110_v25 = vadd.f32 1e-12, %v109_v24  ;;  %v1543_v24 = vld [vmem:[#allocation7 + $0x50] sm:$0xff]  }
 0x15e   :  { %1621 = vrsqrt.f32 %v110_v25  ;;  %v1544_v25 = vld [vmem:[#allocation7 + $0x10] sm:$0xff]  }
 0x16b   :  { %v1622_v29 = vpop.eup %1621 }
 0x16c   :  { %v112_v30 = vmul.f32 %v1622_v29, %v105_v15  ;;  %v1534_v15 = vld [vmem:[#allocation7 + $0x38] sm:$0xff]   ;;  %v1546_v29 = vld [vmem:[#allocation7 + $0x8] sm:$0xff]  }
 0x16e   :  { %v117_v32 = vmul.f32 %v116_v28, %v112_v30  ;;  %v1545_v28 = vld [vmem:[#allocation7 + $0x48] sm:$0xff]   ;;  %v1547_v30 = vld [vmem:[#allocation7 + $0x40] sm:$0xff]  }
 0x170   :  { %v122_v33 = vadd.f32 %v121_v31, %v117_v32  ;;  %v1548_v31 = vld [vmem:[#allocation7] sm:$0xff]  }
 0x171   :  { %v272_v32 = vld [vmem:[%s1948_s6] sm:$0x3] }
 0x172   :  { %v124_v34 = vpack.c.bf16 %v122_v33, %v122_v33 }
 0x174   :  { %1466 = vmatmul.mubr.bf16.vlgmr.msra.gmra.mxu0 %v124_v34  ;;  %v281_v34 = vrot.slane %v272_v32, %v1833_v3 }
 0x175   :  { %1397 = vmatpush3.bf16.msra.mxu0 %v1534_v15 }
 0x176   :  { %1398 = vmatprep.subr.bf16.mxu0 %v1535_v16 }
 0x179   :  { %1399 = vmatpush3.bf16.msra.mxu0 %v1536_v17 }
 0x17a   :  { %1400 = vmatprep.subr.bf16.mxu0 %v1537_v18  ;;  %v1551_v18 = vld [vmem:[#allocation2 + $0x68] sm:$0xff]  }
 0x17d   :  { %1401 = vmatpush3.bf16.msra.mxu0 %v1538_v19  ;;  %v1552_v19 = vld [vmem:[#allocation2 + $0x60] sm:$0xff]  }
 0x17e   :  { %1402 = vmatprep.subr.bf16.mxu0 %v1539_v20  ;;  %v1554_v20 = vld [vmem:[#allocation2 + $0x50] sm:$0xff]  }
 0x181   :  { %1403 = vmatpush3.bf16.msra.mxu0 %v1540_v21  ;;  %v1555_v21 = vld [vmem:[#allocation2 + $0x48] sm:$0xff]  }
 0x182   :  { %1404 = vmatprep.subr.bf16.mxu0 %v1541_v22  ;;  %v1556_v22 = vld [vmem:[#allocation2 + $0x40] sm:$0xff]  }
 0x185   :  { %1405 = vmatpush3.bf16.msra.mxu0 %v1542_v23 }
 0x186   :  { %1406 = vmatprep.subr.bf16.mxu0 %v1543_v24 }
 0x189   :  { %1407 = vmatpush3.bf16.msra.mxu0 %v1544_v25 }
 0x18a   :  { %1408 = vmatprep.subr.bf16.mxu0 %v1545_v28  ;;  %v611_v28 = vsub.s32 4, %v1827_v1 }
 0x18d   :  { %1409 = vmatpush3.bf16.msra.mxu0 %v1546_v29  ;;  %v616_v29 = vsub.s32 5, %v1827_v1 }
 0x18e   :  { %1410 = vmatprep.subr.bf16.mxu0 %v1547_v30  ;;  %v612_v30 = vrot.slane %v1864_v35, %v611_v28 }
 0x191   :  { %1411 = vmatpush3.bf16.msra.mxu0 %v1548_v31 }
 0x234   :  { %v227_v37 = vpop.f32.mrf.mxu0 }
 0x235   :  { %v228_v38 = vadd.f32 %v227_v37, %v144_v36 }
 0x236   :  { %v1467_v39 = vpop.f32.mrf.mxu0 }
 0x237   :  { %v233_v40 = vadd.f32 %v228_v38, %v122_v33  ;;  %v277_v33 = vrot.slane %v272_v32, %v1830_v2 }
 0x238   :  { %v230_v41 = vpop.f32.mrf.mxu0 }
 0x239   :  { %234 = vadd.xlane.f32.xlu1 %v233_v40 }
 0x23a   :  { %v1468_v42 = vpop.f32.mrf.mxu0 }
 0x2c2   :  { %v235_v47 = vpop.xlane.xlu1 %234 }
 0x2c3   :  { %v236_v48 = vmul.f32 0.0078125, %v235_v47 }
 0x2c5   :  { %v237_v49 = vsub.f32 %v233_v40, %v236_v48 }
 0x2c7   :  { %v238_v50 = vmul.f32 %v237_v49, %v237_v49 }
 0x2c9   :  { %239 = vadd.xlane.f32.xlu1 %v238_v50 }
 0x352   :  { %v240_v0 = vpop.xlane.xlu1 %239 }
 0x353   :  { %v241_v4 = vmul.f32 0.0078125, %v240_v0  ;;  %v460_v0 = vrot.slane %v1864_v35, %v1857_v27 }
 0x355   :  { %v242_v5 = vadd.f32 1e-12, %v241_v4 }
 0x357   :  { %1623 = vrsqrt.f32 %v242_v5 }
 0x364   :  { %v1624_v7 = vpop.eup %1623 }
 0x365   :  { %v244_v8 = vmul.f32 %v1624_v7, %v237_v49 }
 0x367   :  { %v249_v10 = vmul.f32 %v248_v6, %v244_v8 }
 0x369   :  { %v1874_v11 = vadd.f32 %v253_v9, %v249_v10  ;;  %v1549_v10 = vld [vmem:[#allocation2 + $0x78] sm:$0xff]  }
 0x36b   :  { %v255_v13 = vpack.c.bf16 %v1874_v11, %v1874_v11 }
 0x36d   :  { %397 = vmatmul.mubr.bf16.vlgmr.msra.gmra.mxu1 %v255_v13  ;;  %v1550_v13 = vld [vmem:[#allocation2 + $0x70] sm:$0xff]  }
 0x36e   :  { %1485 = vmatprep.mubr.msk.bf16.mxu1 %vm1756_vm0, %v1755_v12  ;;  %1470 = vmatpush3.bf16.msra.mxu1 %v1549_v10 }
 0x36f   :  { %1471 = vmatprep.subr.bf16.mxu1 %v1755_v12 }
 0x372   :  { %1472 = vmatpush3.bf16.msra.mxu1 %v1550_v13 }
 0x373   :  { %1473 = vmatprep.subr.bf16.mxu1 %v1755_v12 }
 0x376   :  { %1474 = vmatpush3.bf16.msra.mxu1 %v1551_v18  ;;  %v1583_v18 = vld [vmem:[#allocation7 + $0xf0] sm:$0xff]  }
 0x377   :  { %1475 = vmatprep.subr.bf16.mxu1 %v1755_v12 }
 0x37a   :  { %1476 = vmatpush3.bf16.msra.mxu1 %v1552_v19  ;;  %v1584_v19 = vld [vmem:[#allocation7 + $0xb0] sm:$0xff]  }
 0x37b   :  { %1477 = vmatprep.subr.bf16.mxu1 %v1755_v12 }
 0x42d   :  { %v398_v36 = vpop.f32.mrf.mxu1 }
 0x42e   :  { %v399_v37 = vadd.f32 %v398_v36, %v277_v33  ;;  %v617_v33 = vrot.slane %v1864_v35, %v616_v29  ;;  %v1557_v35 = vld [vmem:[#allocation5 + $0xf0] ss:$8 sps:$4 sm:$0xff]  }
 0x42f   :  { %v400_v38 = vpop.f32.mrf.mxu1 }
 0x430   :  { %v407_v39 = vmul.f32 0.044715, %v399_v37  ;;  %v401_v40 = vadd.f32 %v400_v38, %v281_v34  ;;  %v405_v55 = vmul.f32 0.5, %v399_v37 }
 0x431   :  { %v402_v41 = vpop.f32.mrf.mxu1 }
 0x432   :  { %v409_v42 = vmul.f32 %v407_v39, %v399_v37  ;;  %v408_v43 = vmul.f32 0.044715, %v401_v40  ;;  %v406_v56 = vmul.f32 0.5, %v401_v40 }
 0x433   :  { %v403_v44 = vpop.f32.mrf.mxu1 }
 0x434   :  { %v411_v45 = vmul.f32 %v409_v42, %v399_v37  ;;  %v410_v46 = vmul.f32 %v408_v43, %v401_v40 }
 0x436   :  { %v413_v47 = vadd.f32 %v411_v45, %v399_v37  ;;  %v412_v48 = vmul.f32 %v410_v46, %v401_v40  ;;  %v1907_v37 = vld [vmem:[%s1947_s5 + $0x8] sm:$0x3f]  ;;  %v1559_v45 = vld [vmem:[#allocation5 + $0xf4] ss:$8 sps:$4 sm:$0xff]  }
 0x437   :  { %v642_v38 = vrot.slane %v1907_v37, %v1830_v2  ;;  %v1562_v46 = vld [vmem:[#allocation5 + $0xe4] ss:$8 sps:$4 sm:$0xff]   ;;  %864 = vmatprep.subr.bf16.mxu0 %v1559_v45  ;;  %v751_v10 = vrot.slane %v1907_v37, %v1854_v26 }
 0x438   :  { %v415_v49 = vmul.f32 0.7978846, %v413_v47  ;;  %v414_v50 = vadd.f32 %v412_v48, %v401_v40  ;;  %v1560_v47 = vld [vmem:[#allocation5 + $0xe0] ss:$8 sps:$4 sm:$0xff]  }
 0x439   :  { %v1587_v26 = vld [vmem:[#allocation7 + $0xe0] sm:$0xff]  }
 0x43a   :  { %v416_v51 = vmul.f32 0.7978846, %v414_v50  ;;  %1625 = vtanh.f32 %v415_v49 }
 0x43c   :  { %1627 = vtanh.f32 %v416_v51 }
 0x447   :  { %v1626_v52 = vpop.eup %1625 }
 0x448   :  { %v419_v53 = vadd.f32 1.0, %v1626_v52  ;;  %v1565_v52 = vld [vmem:[#allocation5 + $0xd4] ss:$8 sps:$4 sm:$0xff]  }
 0x449   :  { %v1628_v54 = vpop.eup %1627 }
 0x44a   :  { %v420_v57 = vadd.f32 1.0, %v1628_v54  ;;  %v421_v59 = vmul.f32 %v419_v53, %v405_v55  ;;  %v1563_v53 = vld [vmem:[#allocation5 + $0xd0] ss:$8 sps:$4 sm:$0xff]   ;;  %v1566_v54 = vld [vmem:[#allocation5 + $0xc0] ss:$8 sps:$4 sm:$0xff]  }
 0x44b   :  { %v1568_v55 = vld [vmem:[#allocation5 + $0xc4] ss:$8 sps:$4 sm:$0xff]  }
 0x44c   :  { %v422_v60 = vmul.f32 %v420_v57, %v406_v56  ;;  %v423_v62 = vpack.c.bf16 %v421_v59, %v421_v59  ;;  %v1571_v56 = vld [vmem:[#allocation5 + $0xb4] ss:$8 sps:$4 sm:$0xff]   ;;  %v1569_v57 = vld [vmem:[#allocation5 + $0xb0] ss:$8 sps:$4 sm:$0xff]   ;;  %v1574_v59 = vld [vmem:[#allocation5 + $0xa4] ss:$8 sps:$4 sm:$0xff]  }
 0x44e   :  { %v424_v61 = vpack.c.bf16 %v422_v60, %v422_v60  ;;  %v1572_v60 = vld [vmem:[#allocation5 + $0xa0] ss:$8 sps:$4 sm:$0xff]  }
 0x450   :  { %589 = vmatprep.mubr.bf16.mxu0 %v424_v61  ;;  %v1577_v61 = vld [vmem:[#allocation5 + $0x94] ss:$8 sps:$4 sm:$0xff]  }
 0x451   :  { %590 = vmatmul.mubr.bf16.vlgmr.msra.gmra.mxu0 %v423_v62  ;;  %v1575_v62 = vld [vmem:[#allocation5 + $0x90] ss:$8 sps:$4 sm:$0xff]  }
 0x452   :  { %896 = vmatprep.mubr.bf16.mxu0 %v1757_v58  ;;  %865 = vmatpush1.bf16.msra.mxu0 %v1557_v35 }
 0x453   :  { %866 = vmatprep.subr.bf16.mxu0 %v1562_v46 }
 0x456   :  { %867 = vmatpush1.bf16.msra.mxu0 %v1560_v47 }
 0x457   :  { %868 = vmatprep.subr.bf16.mxu0 %v1565_v52 }
 0x45a   :  { %869 = vmatpush1.bf16.msra.mxu0 %v1563_v53 }
 0x45b   :  { %870 = vmatprep.subr.bf16.mxu0 %v1568_v55 }
 0x45e   :  { %871 = vmatpush1.bf16.msra.mxu0 %v1566_v54 }
 0x45f   :  { %872 = vmatprep.subr.bf16.mxu0 %v1571_v56 }
 0x462   :  { %873 = vmatpush1.bf16.msra.mxu0 %v1569_v57 }
 0x463   :  { %874 = vmatprep.subr.bf16.mxu0 %v1574_v59 }
 0x466   :  { %875 = vmatpush1.bf16.msra.mxu0 %v1572_v60 }
 0x467   :  { %876 = vmatprep.subr.bf16.mxu0 %v1577_v61 }
 0x46a   :  { %877 = vmatpush1.bf16.msra.mxu0 %v1575_v62 }
 0x511   :  { %v1412_v63 = vpop.f32.mrf.mxu0 }
 0x513   :  { %v1413_v4 = vpop.f32.mrf.mxu0 }
 0x514   :  { %v1414_v5 = vadd.f32 %v1413_v4, %v1412_v63  ;;  %v1580_v63 = vld [vmem:[#allocation5 + $0x84] ss:$8 sps:$4 sm:$0xff]  }
 0x515   :  { %v1415_v6 = vpop.f32.mrf.mxu0  ;;  %878 = vmatprep.subr.bf16.mxu0 %v1580_v63 }
 0x516   :  { %v592_v7 = vadd.f32 %v1414_v5, %v460_v0  ;;  %v1578_v0 = vld [vmem:[#allocation5 + $0x80] ss:$8 sps:$4 sm:$0xff]  }
 0x517   :  { %v1416_v8 = vpop.f32.mrf.mxu0  ;;  %879 = vmatpush1.bf16.msra.mxu0 %v1578_v0  ;;  %v961_v0 = vrot.slane %v1907_v37, %v1857_v27 }
 0x518   :  { %v597_v9 = vadd.f32 %v592_v7, %v1874_v11  ;;  %v1553_v11 = vld [vmem:[#allocation2 + $0x58] sm:$0xff]   ;;  %v746_v7 = vrot.slane %v1907_v37, %v1833_v3 }
 0x519   :  { %1478 = vmatpush3.bf16.msra.mxu1 %v1553_v11  ;;  %v1585_v11 = vld [vmem:[#allocation7 + $0xe8] sm:$0xff]  }
 0x51a   :  { %598 = vadd.xlane.f32.xlu0 %v597_v9  ;;  %1479 = vmatprep.subr.bf16.mxu1 %v1755_v12 }
 0x51d   :  { %1480 = vmatpush3.bf16.msra.mxu1 %v1554_v20  ;;  %v1586_v20 = vld [vmem:[#allocation7 + $0xa8] sm:$0xff]  }
 0x51e   :  { %1481 = vmatprep.subr.bf16.mxu1 %v1755_v12 }
 0x521   :  { %1482 = vmatpush3.bf16.msra.mxu1 %v1555_v21  ;;  %v1588_v21 = vld [vmem:[#allocation7 + $0xa0] sm:$0xff]  }
 0x522   :  { %1483 = vmatprep.subr.bf16.mxu1 %v1755_v12 }
 0x525   :  { %1484 = vmatpush3.bf16.msra.mxu1 %v1556_v22  ;;  %v1589_v22 = vld [vmem:[#allocation7 + $0xd8] sm:$0xff]  }
 0x5a3   :  { %v599_v14 = vpop.xlane.xlu0 %598 }
 0x5a4   :  { %v600_v15 = vmul.f32 0.0078125, %v599_v14 }
 0x5a6   :  { %v601_v16 = vsub.f32 %v597_v9, %v600_v15 }
 0x5a8   :  { %v602_v17 = vmul.f32 %v601_v16, %v601_v16 }
 0x5aa   :  { %603 = vadd.xlane.f32.xlu1 %v602_v17  ;;  %v1582_v17 = vld [vmem:[#allocation7 + $0xb8] sm:$0xff]  }
 0x633   :  { %v604_v23 = vpop.xlane.xlu1 %603 }
 0x634   :  { %v605_v24 = vmul.f32 0.0078125, %v604_v23  ;;  %v1590_v23 = vld [vmem:[#allocation7 + $0x98] sm:$0xff]  }
 0x636   :  { %v606_v25 = vadd.f32 1e-12, %v605_v24  ;;  %v1592_v24 = vld [vmem:[#allocation7 + $0x90] sm:$0xff]  }
 0x638   :  { %1629 = vrsqrt.f32 %v606_v25  ;;  %v1593_v25 = vld [vmem:[#allocation7 + $0xc8] sm:$0xff]  }
 0x645   :  { %v1630_v31 = vpop.eup %1629 }
 0x646   :  { %v608_v32 = vmul.f32 %v1630_v31, %v601_v16  ;;  %v1581_v16 = vld [vmem:[#allocation7 + $0xf8] sm:$0xff]   ;;  %v1595_v31 = vld [vmem:[#allocation7 + $0xc0] sm:$0xff]  }
 0x647   :  { %1427 = vmatprep.subr.bf16.mxu1 %v1581_v16  ;;  %v1600_v16 = vld [vmem:[#allocation8 + $0x60] ss:$8 sps:$4 sm:$0xff]  }
 0x648   :  { %v613_v12 = vmul.f32 %v612_v30, %v608_v32  ;;  %v1594_v30 = vld [vmem:[#allocation7 + $0x88] sm:$0xff]   ;;  %v1596_v32 = vld [vmem:[#allocation7 + $0x80] sm:$0xff]  }
 0x64a   :  { %v618_v34 = vadd.f32 %v617_v33, %v613_v12  ;;  %v1338_v33 = vld [vmem:[%s1948_s6 + $0x2] sm:$0x3] }
 0x64b   :  { %v777_v12 = vrot.slane %v1338_v33, %v1830_v2 }
 0x64c   :  { %v621_v36 = vpack.c.bf16 %v618_v34, %v618_v34 }
 0x64e   :  { %1486 = vmatmul.mubr.bf16.vlgmr.msra.gmra.mxu1 %v621_v36 }
 0x64f   :  { %1428 = vmatpush3.bf16.msra.mxu1 %v1582_v17 }
 0x650   :  { %1429 = vmatprep.subr.bf16.mxu1 %v1583_v18 }
 0x653   :  { %1430 = vmatpush3.bf16.msra.mxu1 %v1584_v19 }
 0x654   :  { %1431 = vmatprep.subr.bf16.mxu1 %v1585_v11  ;;  %v1605_v11 = vld [vmem:[#allocation8 + $0x54] ss:$8 sps:$4 sm:$0xff]  }
 0x657   :  { %1432 = vmatpush3.bf16.msra.mxu1 %v1586_v20  ;;  %v1603_v20 = vld [vmem:[#allocation8 + $0x50] ss:$8 sps:$4 sm:$0xff]  }
 0x658   :  { %1433 = vmatprep.subr.bf16.mxu1 %v1587_v26  ;;  %v1606_v26 = vld [vmem:[#allocation8 + $0x40] ss:$8 sps:$4 sm:$0xff]  }
 0x65b   :  { %1434 = vmatpush3.bf16.msra.mxu1 %v1588_v21  ;;  %v1611_v21 = vld [vmem:[#allocation8 + $0x34] ss:$8 sps:$4 sm:$0xff]  }
 0x65c   :  { %1435 = vmatprep.subr.bf16.mxu1 %v1589_v22  ;;  %v1609_v22 = vld [vmem:[#allocation8 + $0x30] ss:$8 sps:$4 sm:$0xff]  }
 0x65f   :  { %1436 = vmatpush3.bf16.msra.mxu1 %v1590_v23  ;;  %v1614_v23 = vld [vmem:[#allocation8 + $0x24] ss:$8 sps:$4 sm:$0xff]  }
 0x70e   :  { %v725_v39 = vpop.f32.mrf.mxu1 }
 0x70f   :  { %v726_v40 = vadd.f32 %v725_v39, %v642_v38 }
 0x710   :  { %v1487_v41 = vpop.f32.mrf.mxu1 }
 0x711   :  { %v731_v42 = vadd.f32 %v726_v40, %v618_v34  ;;  %v781_v34 = vrot.slane %v1338_v33, %v1833_v3 }
 0x712   :  { %v728_v43 = vpop.f32.mrf.mxu1 }
 0x713   :  { %732 = vadd.xlane.f32.xlu0 %v731_v42 }
 0x714   :  { %v1488_v44 = vpop.f32.mrf.mxu1 }
 0x79c   :  { %v733_v48 = vpop.xlane.xlu0 %732 }
 0x79d   :  { %v734_v49 = vmul.f32 0.0078125, %v733_v48 }
 0x79f   :  { %v735_v50 = vsub.f32 %v731_v42, %v734_v49 }
 0x7a1   :  { %v736_v51 = vmul.f32 %v735_v50, %v735_v50 }
 0x7a3   :  { %737 = vadd.xlane.f32.xlu1 %v736_v51 }
 0x82c   :  { %v738_v4 = vpop.xlane.xlu1 %737 }
 0x82d   :  { %v739_v5 = vmul.f32 0.0078125, %v738_v4 }
 0x82f   :  { %v740_v6 = vadd.f32 1e-12, %v739_v5 }
 0x831   :  { %1631 = vrsqrt.f32 %v740_v6 }
 0x83e   :  { %v1632_v8 = vpop.eup %1631 }
 0x83f   :  { %v742_v9 = vmul.f32 %v1632_v8, %v735_v50 }
 0x841   :  { %v747_v13 = vmul.f32 %v746_v7, %v742_v9 }
 0x843   :  { %v1915_v14 = vadd.f32 %v751_v10, %v747_v13  ;;  %v1597_v10 = vld [vmem:[#allocation8 + $0x70] ss:$8 sps:$4 sm:$0xff]   ;;  %v1599_v13 = vld [vmem:[#allocation8 + $0x74] ss:$8 sps:$4 sm:$0xff]  }
 0x844   :  { %1229 = vmatprep.subr.bf16.mxu0 %v1599_v13 }
 0x845   :  { %v753_v15 = vpack.c.bf16 %v1915_v14, %v1915_v14 }
 0x847   :  { %897 = vmatmul.mubr.bf16.vlgmr.msra.gmra.mxu0 %v753_v15  ;;  %v1602_v15 = vld [vmem:[#allocation8 + $0x64] ss:$8 sps:$4 sm:$0xff]  }
 0x848   :  { %1261 = vmatprep.mubr.bf16.mxu0 %v1757_v58  ;;  %v1591_v58 = vld [vmem:[#allocation7 + $0xd0] sm:$0xff]   ;;  %1230 = vmatpush1.bf16.msra.mxu0 %v1597_v10 }
 0x849   :  { %1437 = vmatprep.subr.bf16.mxu1 %v1591_v58  ;;  %1231 = vmatprep.subr.bf16.mxu0 %v1602_v15  ;;  %v1612_v58 = vld [vmem:[#allocation8 + $0x20] ss:$8 sps:$4 sm:$0xff]  }
 0x84a   :  { %1438 = vmatpush3.bf16.msra.mxu1 %v1592_v24  ;;  %v1617_v24 = vld [vmem:[#allocation8 + $0x14] ss:$8 sps:$4 sm:$0xff]  }
 0x84b   :  { %1439 = vmatprep.subr.bf16.mxu1 %v1593_v25  ;;  %v1615_v25 = vld [vmem:[#allocation8 + $0x10] ss:$8 sps:$4 sm:$0xff]  }
 0x84c   :  { %1232 = vmatpush1.bf16.msra.mxu0 %v1600_v16 }
 0x84d   :  { %1233 = vmatprep.subr.bf16.mxu0 %v1605_v11 }
 0x84e   :  { %1440 = vmatpush3.bf16.msra.mxu1 %v1594_v30  ;;  %v1620_v30 = vld [vmem:[#allocation8 + $0x4] ss:$8 sps:$4 sm:$0xff]  }
 0x84f   :  { %1441 = vmatprep.subr.bf16.mxu1 %v1595_v31  ;;  %v1618_v31 = vld [vmem:[#allocation8] ss:$8 sps:$4 sm:$0xff]  }
 0x850   :  { %1234 = vmatpush1.bf16.msra.mxu0 %v1603_v20 }
 0x852   :  { %1442 = vmatpush3.bf16.msra.mxu1 %v1596_v32 }
 0x907   :  { %v898_v36 = vpop.f32.mrf.mxu0 }
 0x908   :  { %v899_v38 = vadd.f32 %v898_v36, %v777_v12 }
 0x909   :  { %v900_v39 = vpop.f32.mrf.mxu0 }
 0x90a   :  { %v907_v40 = vmul.f32 0.044715, %v899_v38  ;;  %v901_v41 = vadd.f32 %v900_v39, %v781_v34  ;;  %v905_v55 = vmul.f32 0.5, %v899_v38  ;;  %v1113_v34 = vrot.slane %v1907_v37, %v611_v28 }
 0x90b   :  { %v902_v42 = vpop.f32.mrf.mxu0  ;;  %v1118_v39 = vrot.slane %v1907_v37, %v616_v29 }
 0x90c   :  { %v909_v43 = vmul.f32 %v907_v40, %v899_v38  ;;  %v908_v44 = vmul.f32 0.044715, %v901_v41  ;;  %v906_v56 = vmul.f32 0.5, %v901_v41 }
 0x90d   :  { %v903_v35 = vpop.f32.mrf.mxu0 }
 0x90e   :  { %v911_v45 = vmul.f32 %v909_v43, %v899_v38  ;;  %v910_v46 = vmul.f32 %v908_v44, %v901_v41  ;;  %v1137_v43 = vld [vmem:[%s1950_s8] sm:$0x3] }
 0x90f   :  { %v1142_v44 = vrot.slane %v1137_v43, %v1830_v2  ;;  %v1146_v35 = vrot.slane %v1137_v43, %v1833_v3 }
 0x910   :  { %v913_v47 = vadd.f32 %v911_v45, %v899_v38  ;;  %v912_v48 = vmul.f32 %v910_v46, %v901_v41 }
 0x912   :  { %v915_v49 = vmul.f32 0.7978846, %v913_v47  ;;  %v914_v50 = vadd.f32 %v912_v48, %v901_v41 }
 0x914   :  { %v916_v51 = vmul.f32 0.7978846, %v914_v50  ;;  %1633 = vtanh.f32 %v915_v49 }
 0x916   :  { %1635 = vtanh.f32 %v916_v51 }
 0x921   :  { %v1634_v52 = vpop.eup %1633 }
 0x922   :  { %v919_v53 = vadd.f32 1.0, %v1634_v52 }
 0x923   :  { %v1636_v54 = vpop.eup %1635 }
 0x924   :  { %v920_v57 = vadd.f32 1.0, %v1636_v54  ;;  %v921_v59 = vmul.f32 %v919_v53, %v905_v55 }
 0x926   :  { %v922_v60 = vmul.f32 %v920_v57, %v906_v56  ;;  %v923_v62 = vpack.c.bf16 %v921_v59, %v921_v59 }
 0x928   :  { %v924_v61 = vpack.c.bf16 %v922_v60, %v922_v60 }
 0x92a   :  { %1090 = vmatprep.mubr.bf16.mxu1 %v924_v61 }
 0x92b   :  { %1091 = vmatmul.mubr.bf16.vlgmr.msra.gmra.mxu1 %v923_v62 }
 0x9eb   :  { %v1443_v63 = vpop.f32.mrf.mxu1 }
 0x9ed   :  { %v1444_v4 = vpop.f32.mrf.mxu1 }
 0x9ee   :  { %v1445_v5 = vadd.f32 %v1444_v4, %v1443_v63 }
 0x9ef   :  { %v1446_v6 = vpop.f32.mrf.mxu1 }
 0x9f0   :  { %v1093_v7 = vadd.f32 %v1445_v5, %v961_v0 }
 0x9f1   :  { %v1447_v8 = vpop.f32.mrf.mxu1 }
 0x9f2   :  { %v1098_v9 = vadd.f32 %v1093_v7, %v1915_v14  ;;  %v1608_v14 = vld [vmem:[#allocation8 + $0x44] ss:$8 sps:$4 sm:$0xff]  }
 0x9f3   :  { %1235 = vmatprep.subr.bf16.mxu0 %v1608_v14 }
 0x9f4   :  { %1099 = vadd.xlane.f32.xlu0 %v1098_v9  ;;  %1236 = vmatpush1.bf16.msra.mxu0 %v1606_v26 }
 0x9f5   :  { %1237 = vmatprep.subr.bf16.mxu0 %v1611_v21 }
 0x9f8   :  { %1238 = vmatpush1.bf16.msra.mxu0 %v1609_v22 }
 0x9f9   :  { %1239 = vmatprep.subr.bf16.mxu0 %v1614_v23 }
 0x9fc   :  { %1240 = vmatpush1.bf16.msra.mxu0 %v1612_v58 }
 0x9fd   :  { %1241 = vmatprep.subr.bf16.mxu0 %v1617_v24 }
 0xa00   :  { %1242 = vmatpush1.bf16.msra.mxu0 %v1615_v25 }
 0xa01   :  { %1243 = vmatprep.subr.bf16.mxu0 %v1620_v30 }
 0xa04   :  { %1244 = vmatpush1.bf16.msra.mxu0 %v1618_v31 }
 0xa7d   :  { %v1100_v17 = vpop.xlane.xlu0 %1099 }
 0xa7e   :  { %v1101_v18 = vmul.f32 0.0078125, %v1100_v17 }
 0xa80   :  { %v1102_v19 = vsub.f32 %v1098_v9, %v1101_v18 }
 0xa82   :  { %v1103_v27 = vmul.f32 %v1102_v19, %v1102_v19 }
 0xa84   :  { %1104 = vadd.xlane.f32.xlu1 %v1103_v27 }
 0xb0d   :  { %v1105_v32 = vpop.xlane.xlu1 %1104 }
 0xb0e   :  { %v1106_v33 = vmul.f32 0.0078125, %v1105_v32 }
 0xb10   :  { %v1107_v12 = vadd.f32 1e-12, %v1106_v33 }
 0xb12   :  { %1637 = vrsqrt.f32 %v1107_v12 }
 0xb1f   :  { %v1638_v36 = vpop.eup %1637 }
 0xb20   :  { %v1109_v38 = vmul.f32 %v1638_v36, %v1102_v19 }
 0xb22   :  { %v1114_v40 = vmul.f32 %v1113_v34, %v1109_v38 }
 0xb24   :  { %v1119_v41 = vadd.f32 %v1118_v39, %v1114_v40 }
 0xb26   :  { %v1120_v42 = vpack.c.bf16 %v1119_v41, %v1119_v41 }
 0xb28   :  { %1262 = vmatmul.mubr.bf16.vlgmr.msra.gmra.mxu0 %v1120_v42 }
 0xbe8   :  { %v1263_v45 = vpop.f32.mrf.mxu0 }
 0xbe9   :  { %v1264_v28 = vadd.f32 %v1263_v45, %v1142_v44 }
 0xbea   :  { %v1265_v46 = vpop.f32.mrf.mxu0 }
 0xbeb   :  { %1270 = vst [vmem:[#allocation10] sm:$0xff] %v1264_v28  ;;  %v1266_v1 = vadd.f32 %v1265_v46, %v1146_v35 }
 0xbec   :  { %v1267_v29 = vpop.f32.mrf.mxu0 }
 0xbed   :  { %1271 = vst [vmem:[#allocation10 + $0x8] sm:$0xff] %v1266_v1 }
 0xbee   :  { %v1268_v37 = vpop.f32.mrf.mxu0 }
 0xbef   :  { %1730 = shalt.err (!%p1727_p10)
}
 0xbf0   :  { %1281 = dma.vmem_to_hbm [thread:$0]  %s1279_s19, 256, %s1951_s9, [#allocation4]  }
 0xbf1   :  { %1745 = dma.done.wait [#allocation4], 256  }
 0xbf2   :  { %1746 = vsyncadd [#allocation4], 4294967040 }
 0xbf3   :  { %1285 = vsyncpa [#allocation3], 1 }
 0xbf4   :  { %1286 = vsyncpa [#allocation6], 1 }
 0xbf5   :  { %1287 = vsyncpa [#allocation9], 1 }
 0xbf6   :  { %1288 = vsyncpa [#allocation4], 1 }

</bundles_post_ra>
